<compile_context>
chip_gen: v6e
topology: v6e:2x2x1
jax: 0.10.0
libtpu: 0.0.40
codegen_flags: <defaults>
</compile_context>

<pallas_src>
import functools

import jax
import jax.numpy as jnp
from jax.experimental import pallas as pl
from jax.experimental.pallas import tpu as pltpu


def _film_kernel(hw, x_ref, g_ref, inw_ref, inb_ref,
                 sw1_ref, sb1_ref, sw2_ref, sb2_ref, o_ref):
    """One grid step == bt batch samples.

    x_ref : (bt, C, HW) f32      g_ref : (bt, C, 1)   (gamma already +1)
    inw_ref / inb_ref : (1, C, 1)  (InstanceNorm affine)
    sw1_ref : (C, Cr)  sb1_ref : (1, Cr)  sw2_ref : (Cr, C)  sb2_ref : (1, C)
    o_ref : (bt, C, HW)
    """
    x = x_ref[...]                                         # (bt, C, HW)
    inv_n = 1.0 / hw

    # ---- single-pass per-(sample, channel) stats of the raw input --------
    # (stats are taken on x itself, not the beta-shifted FiLM output, so the
    #  usual E[x^2]-mean^2 cancellation risk is benign; guard with max anyway)
    s1 = jnp.sum(x, axis=-1, keepdims=True)                # (bt, C, 1)
    s2 = jnp.sum(x * x, axis=-1, keepdims=True)            # (bt, C, 1)
    mean = s1 * inv_n
    var = jnp.maximum(s2 * inv_n - mean * mean, 0.0)

    # ---- fold FiLM(+residual) + InstanceNorm + affine into scale/shift ---
    #   out  = x*(1+gamma) + beta                      (FiLM + residual)
    #   out  = (out - mean_out) * rsqrt(var_out+eps) * in_w + in_b
    # with mean_out = g*mean_x + beta, var_out = g^2*var_x  =>  beta cancels:
    #   out  = x*scale + shift
    #   scale = g*in_w*rsqrt(g^2*var_x + eps),  shift = in_b - mean_x*scale
    g = g_ref[...]
    scale = g * inw_ref[...] * jax.lax.rsqrt(g * g * var + 1e-5)
    shift = inb_ref[...] - mean * scale

    # ---- SE attention: GAP(out) == mean_x*scale + shift (no wide pass) ---
    pooled = (mean * scale + shift)[:, :, 0]               # (bt, C)
    se = jnp.dot(pooled, sw1_ref[...],
                 preferred_element_type=jnp.float32) + sb1_ref[...]
    se = jnp.maximum(se, 0.0)                               # (bt, Cr)
    se = jnp.dot(se, sw2_ref[...],
                 preferred_element_type=jnp.float32) + sb2_ref[...]
    se = jax.nn.sigmoid(se)[:, :, None]                     # (bt, C, 1)

    # ---- single fused wide pass + store -----------------------------------
    o_ref[...] = x * (scale * se) + (shift * se)


def _vmem_capacity_bytes():
    try:
        cap = getattr(pltpu.get_tpu_info(), "vmem_capacity_bytes", None)
        if cap:
            return int(cap)
    except Exception:
        pass
    return 64 << 20            # conservative (v7x-sized) fallback


def film_block_pallas(x, v, params, *, bt=None):
    """x: (B, C, H, W) f32, v: (B, fc_dim) f32, params: dict of weights."""
    B, C, H, W = x.shape
    HW = H * W

    # ---- conditioning MLP hoisted out of the kernel (batched XLA matmuls) ----
    h = jnp.maximum(v @ params["w1"] + params["b1"], 0.0)
    h = jnp.maximum(h @ params["w2"] + params["b2"], 0.0)
    p = h @ params["w3"] + params["b3"]                     # (B, 2C)
    gamma1 = (1.0 + p[:, :C]).reshape(B, C, 1)              # 1 + gamma
    # p[:, C:] (beta) cancels exactly under InstanceNorm -> not fed to kernel.

    in_w = params["in_w"].reshape(1, C, 1)
    in_b = params["in_b"].reshape(1, C, 1)
    sw1, sb1 = params["se_w1"], params["se_b1"]
    sw2, sb2 = params["se_w2"], params["se_b2"]
    Cr = sw1.shape[1]

    x_flat = x.reshape(B, C, HW)      # no padding: last block dim == full HW

    # ---- generation-aware VMEM budget and samples-per-step selection ------
    vmem_cap = _vmem_capacity_bytes()
    if vmem_cap >= (100 << 20):            # 128 MiB parts (v5e / v6e)
        block_budget, vmem_cap_limit = 48 << 20, 96 << 20
    else:                                  # 64 MiB parts (v7x)
        block_budget, vmem_cap_limit = 20 << 20, 56 << 20

    per_sample = C * HW * 4                # f32 bytes of one (1, C, HW) slab
    if bt is None:
        bt = max(1, min(B, block_budget // (4 * per_sample)))
        if B >= 2:                         # >= 2 grid steps: both v7x TCs busy
            bt = min(bt, -(-B // 2))
    grid = (pl.cdiv(B, bt),)

    block_bytes = bt * per_sample
    vmem_limit = int(min(max(5 * block_bytes + (4 << 20), 16 << 20),
                         vmem_cap_limit))

    out = pl.pallas_call(
        functools.partial(_film_kernel, HW),
        out_shape=jax.ShapeDtypeStruct((B, C, HW), jnp.float32),
        grid_spec=pltpu.PrefetchScalarGridSpec(
            num_scalar_prefetch=0,
            grid=grid,
            in_specs=[
                pl.BlockSpec((bt, C, HW), lambda i: (i, 0, 0)),   # x
                pl.BlockSpec((bt, C, 1), lambda i: (i, 0, 0)),    # 1+gamma
                pl.BlockSpec((1, C, 1), lambda i: (0, 0, 0)),     # in_w
                pl.BlockSpec((1, C, 1), lambda i: (0, 0, 0)),     # in_b
                pl.BlockSpec((C, Cr), lambda i: (0, 0)),          # se_w1
                pl.BlockSpec((1, Cr), lambda i: (0, 0)),          # se_b1
                pl.BlockSpec((Cr, C), lambda i: (0, 0)),          # se_w2
                pl.BlockSpec((1, C), lambda i: (0, 0)),           # se_b2
            ],
            out_specs=pl.BlockSpec((bt, C, HW), lambda i: (i, 0, 0)),
        ),
        input_output_aliases={0: 0},       # output reuses x_flat's buffer
        compiler_params=pltpu.CompilerParams(
            dimension_semantics=("parallel",),
            vmem_limit_bytes=vmem_limit),
    )(x_flat, gamma1, in_w, in_b, sw1, sb1, sw2, sb2)

    return out.reshape(B, C, H, W)


def film_block_ref(x, v, p):
    """Pure-JAX reference mirroring the PyTorch forward (for verification)."""
    B, C, H, W = x.shape
    h = jax.nn.relu(v @ p["w1"] + p["b1"])
    h = jax.nn.relu(h @ p["w2"] + p["b2"])
    fp = h @ p["w3"] + p["b3"]
    gamma = fp[:, :C][:, :, None, None]
    beta = fp[:, C:][:, :, None, None]
    out = x + (x * gamma + beta)
    mean = out.mean(axis=(2, 3), keepdims=True)
    var = ((out - mean) ** 2).mean(axis=(2, 3), keepdims=True)
    out = (out - mean) / jnp.sqrt(var + 1e-5)
    out = out * p["in_w"][0][None, :, None, None] + p["in_b"][0][None, :, None, None]
    pooled = out.mean(axis=(2, 3))
    s = jax.nn.relu(pooled @ p["se_w1"] + p["se_b1"])
    s = jax.nn.sigmoid(s @ p["se_w2"] + p["se_b2"])
    return out * s[:, :, None, None]


def make_params(key, fc_dim, C, reduction):
    Cr = C // reduction
    ks = jax.random.split(key, 12)
    n = lambda k, s, scale=0.2: (scale * jax.random.normal(k, s)).astype(jnp.float32)
    return {
        # MLP (weights stored pre-transposed: (in, out))
        "w1": n(ks[0], (fc_dim, 2 * C)), "b1": n(ks[1], (1, 2 * C)),
        "w2": n(ks[2], (2 * C, 4 * C)), "b2": n(ks[3], (1, 4 * C)),
        "w3": n(ks[4], (4 * C, 2 * C)), "b3": n(ks[5], (1, 2 * C)),
        # InstanceNorm2d affine
        "in_w": (1.0 + n(ks[6], (1, C))).astype(jnp.float32),
        "in_b": n(ks[7], (1, C)),
        # SE 1x1 convs (as (in, out) matrices)
        "se_w1": n(ks[8], (C, Cr)), "se_b1": n(ks[9], (1, Cr)),
        "se_w2": n(ks[10], (Cr, C)), "se_b2": n(ks[11], (1, C)),
    }


if __name__ == "__main__":
    B, C, H, W = 2, 4, 16, 16
    fc_dim, reduction = 32, 4

    key = jax.random.PRNGKey(0)
    kx, kv, kp = jax.random.split(key, 3)
    x = jax.random.normal(kx, (B, C, H, W), dtype=jnp.float32)
    v = jax.random.normal(kv, (B, fc_dim), dtype=jnp.float32)
    params = make_params(kp, fc_dim, C, reduction)

    # Reference computed first (the kernel may alias/reuse x's buffer).
    ref = film_block_ref(x, v, params)
    ref = jax.block_until_ready(ref)

    out = film_block_pallas(x, v, params)
    out = jax.block_until_ready(out)

    err = jnp.max(jnp.abs(out - ref))
    assert jnp.allclose(out, ref, atol=1e-4, rtol=1e-4), f"max abs err {err}"
    print("KERNEL_OK")
</pallas_src>

<mosaic_0001>
module attributes {stable_mosaic.version = 11 : i64} {
  func.func @_film_kernel(%arg0: i32, %arg1: memref<1x4x256xf32, #tpu.memory_space<vmem>>, %arg2: memref<1x4x1xf32, #tpu.memory_space<vmem>>, %arg3: memref<1x4x1xf32, #tpu.memory_space<vmem>>, %arg4: memref<1x4x1xf32, #tpu.memory_space<vmem>>, %arg5: memref<4x1xf32, #tpu.memory_space<vmem>>, %arg6: memref<1x1xf32, #tpu.memory_space<vmem>>, %arg7: memref<1x4xf32, #tpu.memory_space<vmem>>, %arg8: memref<1x4xf32, #tpu.memory_space<vmem>>, %arg9: memref<1x4x256xf32, #tpu.memory_space<vmem>>) attributes {dimension_semantics = [#tpu.dimension_semantics<parallel>], iteration_bounds = array<i64: 2>, scalar_prefetch = 0 : i64, scratch_operands = 0 : i64, tpu.core_type = #tpu.core_type<tc>, window_params = [{transform_indices = @transform_0, window_bounds = array<i64: 1, 4, 256>}, {transform_indices = @transform_1, window_bounds = array<i64: 1, 4, 1>}, {pipeline_mode = #tpu.pipeline_mode<synchronous>, transform_indices = @transform_2, window_bounds = array<i64: 1, 4, 1>}, {pipeline_mode = #tpu.pipeline_mode<synchronous>, transform_indices = @transform_3, window_bounds = array<i64: 1, 4, 1>}, {pipeline_mode = #tpu.pipeline_mode<synchronous>, transform_indices = @transform_4, window_bounds = array<i64: 4, 1>}, {pipeline_mode = #tpu.pipeline_mode<synchronous>, transform_indices = @transform_5, window_bounds = array<i64: 1, 1>}, {pipeline_mode = #tpu.pipeline_mode<synchronous>, transform_indices = @transform_6, window_bounds = array<i64: 1, 4>}, {pipeline_mode = #tpu.pipeline_mode<synchronous>, transform_indices = @transform_7, window_bounds = array<i64: 1, 4>}, {transform_indices = @transform_8, window_bounds = array<i64: 1, 4, 256>}]} {
    %c0 = arith.constant 0 : index
    %c0_0 = arith.constant 0 : index
    %c0_1 = arith.constant 0 : index
    %0 = vector.load %arg1[%c0, %c0_0, %c0_1] : memref<1x4x256xf32, #tpu.memory_space<vmem>>, vector<1x4x256xf32>
    %cst = arith.constant dense<0.000000e+00> : vector<1x4xf32>
    %1 = vector.multi_reduction <add>, %0, %cst [2] : vector<1x4x256xf32> to vector<1x4xf32>
    %2 = vector.shape_cast %1 : vector<1x4xf32> to vector<1x4x1xf32>
    %3 = arith.mulf %0, %0 : vector<1x4x256xf32>
    %cst_2 = arith.constant dense<0.000000e+00> : vector<1x4xf32>
    %4 = vector.multi_reduction <add>, %3, %cst_2 [2] : vector<1x4x256xf32> to vector<1x4xf32>
    %5 = vector.shape_cast %4 : vector<1x4xf32> to vector<1x4x1xf32>
    %cst_3 = arith.constant 3.906250e-03 : f32
    %6 = vector.broadcast %cst_3 : f32 to vector<1x4x1xf32>
    %7 = arith.mulf %2, %6 : vector<1x4x1xf32>
    %cst_4 = arith.constant 3.906250e-03 : f32
    %8 = vector.broadcast %cst_4 : f32 to vector<1x4x1xf32>
    %9 = arith.mulf %5, %8 : vector<1x4x1xf32>
    %10 = arith.mulf %7, %7 : vector<1x4x1xf32>
    %11 = arith.subf %9, %10 : vector<1x4x1xf32>
    %cst_5 = arith.constant 0.000000e+00 : f32
    %12 = vector.broadcast %cst_5 : f32 to vector<1x4x1xf32>
    %13 = arith.maximumf %11, %12 : vector<1x4x1xf32>
    %c0_6 = arith.constant 0 : index
    %c0_7 = arith.constant 0 : index
    %c0_8 = arith.constant 0 : index
    %14 = vector.load %arg2[%c0_6, %c0_7, %c0_8] : memref<1x4x1xf32, #tpu.memory_space<vmem>>, vector<1x4x1xf32>
    %c0_9 = arith.constant 0 : index
    %c0_10 = arith.constant 0 : index
    %c0_11 = arith.constant 0 : index
    %15 = vector.load %arg3[%c0_9, %c0_10, %c0_11] : memref<1x4x1xf32, #tpu.memory_space<vmem>>, vector<1x4x1xf32>
    %16 = arith.mulf %14, %15 : vector<1x4x1xf32>
    %17 = arith.mulf %14, %14 : vector<1x4x1xf32>
    %18 = arith.mulf %17, %13 : vector<1x4x1xf32>
    %cst_12 = arith.constant 9.99999974E-6 : f32
    %19 = vector.broadcast %cst_12 : f32 to vector<1x4x1xf32>
    %20 = arith.addf %18, %19 : vector<1x4x1xf32>
    %21 = math.rsqrt %20 : vector<1x4x1xf32>
    %22 = arith.mulf %16, %21 : vector<1x4x1xf32>
    %c0_13 = arith.constant 0 : index
    %c0_14 = arith.constant 0 : index
    %c0_15 = arith.constant 0 : index
    %23 = vector.load %arg4[%c0_13, %c0_14, %c0_15] : memref<1x4x1xf32, #tpu.memory_space<vmem>>, vector<1x4x1xf32>
    %24 = arith.mulf %7, %22 : vector<1x4x1xf32>
    %25 = arith.subf %23, %24 : vector<1x4x1xf32>
    %26 = arith.mulf %7, %22 : vector<1x4x1xf32>
    %27 = arith.addf %26, %25 : vector<1x4x1xf32>
    %28 = vector.shape_cast %27 : vector<1x4x1xf32> to vector<1x4xf32>
    %c0_16 = arith.constant 0 : index
    %c0_17 = arith.constant 0 : index
    %29 = vector.load %arg5[%c0_16, %c0_17] : memref<4x1xf32, #tpu.memory_space<vmem>>, vector<4x1xf32>
    %cst_18 = arith.constant dense<0.000000e+00> : vector<1x1xf32>
    %30 = tpu.matmul %28, %29, %cst_18 {dimension_numbers = #tpu.dot_dimension_numbers<[1], [0], [0], [1], [0, 0, 1, 1], [], []>} : vector<1x4xf32>, vector<4x1xf32>, vector<1x1xf32> -> vector<1x1xf32>
    %c0_19 = arith.constant 0 : index
    %c0_20 = arith.constant 0 : index
    %31 = vector.load %arg6[%c0_19, %c0_20] : memref<1x1xf32, #tpu.memory_space<vmem>>, vector<1x1xf32>
    %32 = arith.addf %30, %31 : vector<1x1xf32>
    %cst_21 = arith.constant 0.000000e+00 : f32
    %33 = vector.broadcast %cst_21 : f32 to vector<1x1xf32>
    %34 = arith.maximumf %32, %33 : vector<1x1xf32>
    %c0_22 = arith.constant 0 : index
    %c0_23 = arith.constant 0 : index
    %35 = vector.load %arg7[%c0_22, %c0_23] : memref<1x4xf32, #tpu.memory_space<vmem>>, vector<1x4xf32>
    %cst_24 = arith.constant dense<0.000000e+00> : vector<1x4xf32>
    %36 = tpu.matmul %34, %35, %cst_24 {dimension_numbers = #tpu.dot_dimension_numbers<[1], [0], [0], [1], [0, 0, 1, 1], [], []>} : vector<1x1xf32>, vector<1x4xf32>, vector<1x4xf32> -> vector<1x4xf32>
    %c0_25 = arith.constant 0 : index
    %c0_26 = arith.constant 0 : index
    %37 = vector.load %arg8[%c0_25, %c0_26] : memref<1x4xf32, #tpu.memory_space<vmem>>, vector<1x4xf32>
    %38 = arith.addf %36, %37 : vector<1x4xf32>
    %39 = arith.negf %38 : vector<1x4xf32>
    %40 = math.exp %39 : vector<1x4xf32>
    %cst_27 = arith.constant 1.000000e+00 : f32
    %41 = vector.broadcast %cst_27 : f32 to vector<1x4xf32>
    %42 = arith.addf %41, %40 : vector<1x4xf32>
    %43 = arith.divf %41, %42 : vector<1x4xf32>
    %44 = vector.shape_cast %43 : vector<1x4xf32> to vector<1x4x1xf32>
    %45 = arith.mulf %22, %44 : vector<1x4x1xf32>
    %46 = vector.broadcast %45 : vector<1x4x1xf32> to vector<1x4x256xf32>
    %47 = arith.mulf %0, %46 : vector<1x4x256xf32>
    %48 = arith.mulf %25, %44 : vector<1x4x1xf32>
    %49 = vector.broadcast %48 : vector<1x4x1xf32> to vector<1x4x256xf32>
    %50 = arith.addf %47, %49 : vector<1x4x256xf32>
    %c0_28 = arith.constant 0 : index
    %c0_29 = arith.constant 0 : index
    %c0_30 = arith.constant 0 : index
    %51 = vector.load %arg9[%c0_28, %c0_29, %c0_30] : memref<1x4x256xf32, #tpu.memory_space<vmem>>, vector<1x4x256xf32>
    tpu.vector_store %arg9[%c0_28, %c0_29, %c0_30], %50 {strides = array<i32>} : memref<1x4x256xf32, #tpu.memory_space<vmem>>, vector<1x4x256xf32>,
    return
  }
  func.func @transform_0(%arg0: i32) -> (i32, i32, i32) {
    %c0_i32 = arith.constant 0 : i32
    %c0_i32_0 = arith.constant 0 : i32
    %c0_i32_1 = arith.constant 0 : i32
    return %arg0, %c0_i32, %c0_i32_0 : i32, i32, i32
  }
  func.func @transform_1(%arg0: i32) -> (i32, i32, i32) {
    %c0_i32 = arith.constant 0 : i32
    %c0_i32_0 = arith.constant 0 : i32
    %c0_i32_1 = arith.constant 0 : i32
    return %arg0, %c0_i32, %c0_i32_0 : i32, i32, i32
  }
  func.func @transform_2(%arg0: i32) -> (i32, i32, i32) {
    %c0_i32 = arith.constant 0 : i32
    %c0_i32_0 = arith.constant 0 : i32
    %c0_i32_1 = arith.constant 0 : i32
    %c0_i32_2 = arith.constant 0 : i32
    return %c0_i32, %c0_i32_0, %c0_i32_1 : i32, i32, i32
  }
  func.func @transform_3(%arg0: i32) -> (i32, i32, i32) {
    %c0_i32 = arith.constant 0 : i32
    %c0_i32_0 = arith.constant 0 : i32
    %c0_i32_1 = arith.constant 0 : i32
    %c0_i32_2 = arith.constant 0 : i32
    return %c0_i32, %c0_i32_0, %c0_i32_1 : i32, i32, i32
  }
  func.func @transform_4(%arg0: i32) -> (i32, i32) {
    %c0_i32 = arith.constant 0 : i32
    %c0_i32_0 = arith.constant 0 : i32
    %c0_i32_1 = arith.constant 0 : i32
    return %c0_i32, %c0_i32_0 : i32, i32
  }
  func.func @transform_5(%arg0: i32) -> (i32, i32) {
    %c0_i32 = arith.constant 0 : i32
    %c0_i32_0 = arith.constant 0 : i32
    %c0_i32_1 = arith.constant 0 : i32
    return %c0_i32, %c0_i32_0 : i32, i32
  }
  func.func @transform_6(%arg0: i32) -> (i32, i32) {
    %c0_i32 = arith.constant 0 : i32
    %c0_i32_0 = arith.constant 0 : i32
    %c0_i32_1 = arith.constant 0 : i32
    return %c0_i32, %c0_i32_0 : i32, i32
  }
  func.func @transform_7(%arg0: i32) -> (i32, i32) {
    %c0_i32 = arith.constant 0 : i32
    %c0_i32_0 = arith.constant 0 : i32
    %c0_i32_1 = arith.constant 0 : i32
    return %c0_i32, %c0_i32_0 : i32, i32
  }
  func.func @transform_8(%arg0: i32) -> (i32, i32, i32) {
    %c0_i32 = arith.constant 0 : i32
    %c0_i32_0 = arith.constant 0 : i32
    %c0_i32_1 = arith.constant 0 : i32
    return %arg0, %c0_i32, %c0_i32_0 : i32, i32, i32
  }
}

</mosaic_0001>

<bundles_post_ra>
// kernel: tpu_custom_call.1
= control target key start
LH: loop header
LB: loop body
LE: loop exit
PB: predicated region body
PF: predicated region fallthrough
CT: control target
= control target key end

     0   :  { %s1106_s0 = inlined_call_operand.hbm [shape: f32[2,4,256], index: 0, kind: input, shape index: {}, may-alias: {0,8}]   ;;  %s1107_s1 = inlined_call_operand.vmem [shape: f32[2,4,1], index: 1, kind: input, shape index: {}]   ;;  %s1108_s2 = inlined_call_operand.vmem [shape: f32[1,4,1], index: 2, kind: input, shape index: {}]   ;;  %s1109_s3 = inlined_call_operand.vmem [shape: f32[1,4,1], index: 3, kind: input, shape index: {}]   ;;  %s1110_s4 = inlined_call_operand.vmem [shape: f32[4,1], index: 4, kind: input, shape index: {}]   ;;  %s1111_s5 = inlined_call_operand.<no memory space> [shape: f32[1,1], index: 5, kind: input, shape index: {}]   ;;  %s1112_s6 = inlined_call_operand.vmem [shape: f32[1,4], index: 6, kind: input, shape index: {}]   ;;  %s1113_s7 = inlined_call_operand.vmem [shape: f32[1,4], index: 7, kind: input, shape index: {}]   ;;  %s1114_s8 = inlined_call_operand.hbm [shape: f32[2,4,256], index: 8, kind: output, shape index: {}, may-alias: {0,8}]  }
   0x1   :  { %v13_v0 = vstv %s1111_s5 }
   0x2   :  { %14 = vst [vmem:[#allocation2] sm:$0x1] %v13_v0 }
   0x3   :  { %15 = vsyncpa [#allocation4], 0 }
   0x4   :  { %17 = vsyncpa [#allocation4 + $0x1], 0 }
   0x5   :  { %18 = vsyncpa [#allocation5], 0 }
   0x6   :  { %20 = vsyncpa [#allocation5 + $0x1], 0  ;;  %s928_s29 = smov 0   ;;  %s930_s30 = smov 0  }
   0x7   :  { %s932_s9 = smov 0   ;;  %s934_s10 = smov 0  }
   0x8 LB: > { %s949_s5 = sadd.s32 4294967295, %s872_s10   ;;  %s685_s11 = sadd.s32 4294967294, %s872_s10   ;;  %s872_s10 = sphi %s934_s10, %s1131_s10   ;;  %s868_s9 = sphi %s932_s9, %s1130_s9   ;;  %s864_s30 = sphi %s930_s30, %s1129_s30   ;;  %s860_s29 = sphi %s928_s29, %s1128_s29  }
   0x9   : > { %s953_s12 = sadd.s32 1, %s872_s10   ;;  %s33_s13 = sadd.s32 1, %s868_s9 }
   0xa   : > { %s30_s14 = ssub.s32 %s872_s10, %s953_s12  ;;  %p40_p0 = scmp.ne.s32.totalorder %s868_s9, %s864_s30 }
   0xb   : > { %p31_p1 = scmp.eq.s32.totalorder %s30_s14, 0  ;;  %p41_p2 = scmp.eq.s32.totalorder %s872_s10, 0 }
   0xc   : > { %p46_p3 = scmp.ne.s32.totalorder %s864_s30, %s860_s29  ;;  %p47_p4 = scmp.eq.s32.totalorder %s949_s5, 0 }
   0xd   : > { %s965_s15 = scalar_select %p31_p1, %s868_s9, %s33_s13  }
   0xe   : > { %p967_p5 = por %p41_p2, %p40_p0  ;;  %p971_p6 = por %p47_p4, %p46_p3 }
   0xf   : > { %p222_p7 = scmp.eq.s32.totalorder %s949_s5, 1  ;;  %p228_p8 = scmp.eq.s32.totalorder %s685_s11, 1 }
  0x10   : > { %s1118_s17 = scalar_select %p971_p6, 1, 0 }
  0x11   : > { %p733_p10 = scmp.lt.s32.totalorder %s872_s10, 2  ;;  %p978_p11 = por %p222_p7, %p40_p0 }
  0x12   : > { %p982_p12 = por %p228_p8, %p46_p3  ;;  %s266_s20 = sand.u32 1, %s868_s9  }
  0x13   : > { %s1119_s18 = scalar_select %p978_p11, 1, 0 }
  0x14   : > { %s1120_s19 = scalar_select %p982_p12, 1, 0 }
  0x15   : > { %s705_s21 = sshll.u32 %s872_s10, 7  ;;  %s688_s22 = sshll.u32 %s266_s20, 3 }
  0x16   : > { %s991_s25 = scalar_lea.hbm %s1106_s0, %s705_s21  ;;  %s270_s26 = scalar_lea.vmem [#allocation3], %s688_s22 }
  0x17   : > { %s278_s27 = sshll.u32 %s270_s26, 4  ;;  %p995_p13 = pnand %p733_p10, %p967_p5  ;;  %s999_s27 = int_to_ptr.vmem [resolvable:$true] %s278_s27 }
  0x18   : > { %s267_s11 = scalar_lea.sflag [#allocation4], %s266_s20  ;;  %s780_s13 = scalar_lea.hbm %s991_s25, 128 }
  0x19   : > { %p781_p2 = scmp.ne.s32.totalorder %s991_s25, %s780_s13  ;;  %p782_p3 = pneg %p995_p13 }
  0x1a   : > { %s785_s16 = scalar_lea.hbm %s1106_s0, 256  ;;  %p786_p5 = scmp.lt.s32.totalorder %s991_s25, %s1106_s0 }
  0x1b   : > { %p783_p4 = pnand %p782_p3, %p781_p2  ;;  %p787_p8 = scmp.lt.s32.totalorder %s785_s16, %s780_s13 }
  0x1d   : > { %p784_p7 = pneg %p783_p4  ;;  %p788_p10 = por %p787_p8, %p786_p5 }
  0x1f   : > { %p789_p9 = pnand %p788_p10, %p784_p7 }
  0x21   : > { %792 = shalt.err (!%p789_p9)
}
  0x22   : > { %s793_s20 = scalar_lea.vmem %s999_s27, 128  ;;  %s874_s24 = smov [#allocation3]  }
  0x23   : > { %p794_p0 = scmp.ne.s32.totalorder %s999_s27, %s793_s20  ;;  %s798_s26 = sshll.u32 %s874_s24, 4  ;;  %s799_s26 = int_to_ptr.vmem [resolvable:$false] %s798_s26 }
  0x24   : > { %s800_s14 = scalar_lea.vmem %s799_s26, 256  ;;  %p801_p4 = scmp.lt.s32.totalorder %s999_s27, %s799_s26 }
  0x25   : > { %p796_p1 = pnand %p794_p0, %p782_p3  ;;  %p802_p12 = scmp.lt.s32.totalorder %s800_s14, %s793_s20 }
  0x27   : > { %p797_p2 = pneg %p796_p1  ;;  %p803_p11 = por %p802_p12, %p801_p4 }
  0x29   : > { %p804_p6 = pnand %p803_p11, %p797_p2 }
  0x2b   : > { %807 = shalt.err (!%p804_p6)
}
  0x2c   : > { %728 = dma.hbm_to_vmem [thread:$0]  (!%p995_p13), %s991_s25, 128, %s999_s27, %s267_s11  }
  0x2d   : > { %p1122_p9 = scmp.lt.s32.totalorder %s872_s10, 3  ;;  %p1123_p7 = scmp.ge.s32.totalorder %s872_s10, 1 }
  0x2f   : > { %p291_p0 = pnand %p1123_p7, %p1122_p9 }
  0x30   : > { %s1026_s13 = sand.u32 (!%p291_p0), 1, %s864_s30   ;;  %p1124_p6 = scmp.ne.s32.totalorder (!%p291_p0), %s1118_s17, 0 }
  0x31   : > { %294 = sbr.rel (%p291_p0) target bundleno = 1047 (0x417), region = 52  ;;  %s692_s21 = sshll.u32 (!%p291_p0), %s1026_s13, 3 }
  0x32   : > { %s297_s16 = scalar_lea.sflag (!%p291_p0), [#allocation4], %s1026_s13  ;;  %s300_s28 = scalar_lea.vmem (!%p291_p0), [#allocation3], %s692_s21 }
  0x36   : > { %851 = dma.done.wait (%p1124_p6), %s297_s16, 128  }
  0x37   : > { %853 = vsyncadd (%p1124_p6), %s297_s16, 4294967168  ;;  %vm345_vm0 = vcmask 1043456   ;;  %v1036_v1 = vld [vmem:[%s300_s28] sm:$0xff]  ;;  %v875_v11 = vmov 0   ;;  %p337_p11 = scmp.lt.s32.totalorder %s949_s5, 1  ;;  %v876_v30 = vmov 0.0   ;;  %v383_v33 = vlaneseq }
  0x38   : > { %v343_v2 = vcombine.high %v1036_v1, %v1036_v1  ;;  %v346_v3 = vsel %vm345_vm0, %v1036_v1, 0.0  ;;  %v351_v4 = vmul.f32 %v1036_v1, %v1036_v1  ;;  %771 = vset.pattern.permute.xlu1 %v875_v11  ;;  %772 = vset.pattern.permute.xlu0 %v875_v11  ;;  %v366_v23 = vld [vmem:[%s1108_s2] sm:$0xf]  ;;  %vm877_vm1 = vmmov 0   ;;  %s706_s11 = sshll.u32 %s949_s5, 7  ;;  %s589_s14 = scalar_lea.sflag [#allocation5], %s1026_s13 }
  0x39   : > { %s338_s17 = scalar_select %p337_p11, %s949_s5, 1  ;;  %v373_v27 = vld [vmem:[%s1109_s3] sm:$0xf]  ;;  %711 = vmatprep.subr.mxu0 %v876_v30  ;;  %716 = vmatprep.subr.mxu1 %v876_v30  ;;  %v384_v34 = vand.u32 127, %v383_v33  ;;  %v386_v35 = vshrl.u32 %v383_v33, 7  ;;  %vm389_vm2 = vcmask 31744  }
  0x3a   : > { %v347_v5 = vsel %vm345_vm0, %v343_v2, 0.0  ;;  %v353_v6 = vcombine.high %v351_v4, %v351_v4  ;;  %v355_v7 = vsel %vm345_vm0, %v351_v4, 0.0  ;;  %v377_v31 = vld [vmem:[%s1110_s4] sm:$0xf]  ;;  %713 = vmatprep.mubr.msk.f32.mxu0 %vm877_vm1, %v876_v30  ;;  %718 = vmatprep.mubr.msk.f32.mxu1 %vm877_vm1, %v876_v30  ;;  %vm472_vm3 = vcmask 1040384   ;;  %s601_s26 = scalar_lea.hbm %s1114_s8, %s706_s11  ;;  %p1125_p13 = scmp.ne.s32.totalorder %s1119_s18, 0 }
  0x3b   : > { %v348_v8 = vadd.f32 %v347_v5, %v346_v3  ;;  %s694_s25 = sshll.u32 %s338_s17, 2  ;;  %712 = vmatpush3.msk.msra.mxu0 %vm345_vm0, %v377_v31  ;;  %v387_v36 = vsub.s32 %v384_v34, %v386_v35  ;;  %v466_v39 = vld [vmem:[%s1112_s6] sm:$0x1]  ;;  %vm468_vm4 = vcmask 7168   ;;  %v554_v52 = vsub.s32 0, %v386_v35  ;;  %s879_s5 = smov [#allocation6]  }
  0x3c   : > { %v356_v9 = vsel %vm345_vm0, %v353_v6, 0.0  ;;  %s340_s22 = scalar_lea.vmem %s1107_s1, %s694_s25  ;;  %717 = vmatpush3.msk.msra.mxu1 %vm472_vm3, %v466_v39  ;;  %v378_v40 = vld [vmem:[#allocation2] sm:$0x1]  ;;  %v878_v58 = vmov 839922192   ;;  %s812_s28 = sshll.u32 %s879_s5, 4  ;;  %s813_s28 = int_to_ptr.vmem [resolvable:$false] %s812_s28 }
  0x3d   : > { %349 = vadd.xlane.f32.xlu0 %v348_v8  ;;  %v357_v10 = vadd.f32 %v356_v9, %v355_v7  ;;  %v365_v14 = vld [vmem:[%s340_s22] sm:$0xf]  ;;  %v565_v59 = vunpack.c.l.s4 %v878_v58  ;;  %s336_s22 = scalar_lea.vmem [#allocation6], %s692_s21  ;;  %s814_s21 = scalar_lea.vmem %s813_s28, 256 }
  0x3e   : > { %v368_v18 = vmul.f32 %v365_v14, %v365_v14  ;;  %v367_v24 = vmul.f32 %v366_v23, %v365_v14  ;;  %v467_v45 = vld [vmem:[%s1113_s7] sm:$0x1]  ;;  %s603_s23 = sshll.u32 %s336_s22, 4  ;;  %s604_s23 = int_to_ptr.vmem [resolvable:$true] %s603_s23 }
  0x3f   : > { %v566_v60 = vunpack.c.0.s8 %v565_v59  ;;  %s808_s16 = scalar_lea.vmem %s604_s23, 128  ;;  %p815_p5 = scmp.lt.s32.totalorder %s604_s23, %s813_s28 }
  0x40   : > { %p809_p12 = scmp.ne.s32.totalorder %s604_s23, %s808_s16  ;;  %p816_p8 = scmp.lt.s32.totalorder %s814_s21, %s808_s16 }
  0x41   : > { %358 = vadd.xlane.f32.xlu0 %v357_v10  ;;  %v569_v61 = vsub.s32 %v566_v60, %v386_v35 }
  0x42   : > { %p810_p1 = pnand %p809_p12, %p1125_p13  ;;  %p817_p10 = por %p816_p8, %p815_p5 }
  0x44   : > { %p811_p3 = pneg %p810_p1 }
  0x46   : > { %p818_p2 = pnand %p817_p10, %p811_p3 }
  0xc6   : > { %v350_v12 = vpop.xlane.xlu0 %349 }
  0xc7   : > { %v360_v13 = vmul.f32 0.00390625, %v350_v12 }
  0xc9   : > { %v362_v16 = vmul.f32 %v360_v13, %v360_v13 }
  0xca   : > { %v359_v15 = vpop.xlane.xlu0 %358 }
  0xcb   : > { %v361_v17 = vmul.f32 0.00390625, %v359_v15 }
  0xcd   : > { %v363_v19 = vsub.f32 %v361_v17, %v362_v16 }
  0xcf   : > { %v364_v20 = vmax.f32 %v363_v19, 0.0 }
  0xd1   : > { %v369_v21 = vmul.f32 %v368_v18, %v364_v20 }
  0xd3   : > { %v370_v22 = vadd.f32 1e-05, %v369_v21 }
  0xd5   : > { %774 = vrsqrt.f32 %v370_v22 }
  0xe2   : > { %v775_v25 = vpop.eup %774 }
  0xe3   : > { %v372_v26 = vmul.f32 %v775_v25, %v367_v24 }
  0xe5   : > { %v374_v28 = vmul.f32 %v372_v26, %v360_v13 }
  0xe7   : > { %v375_v29 = vsub.f32 %v373_v27, %v374_v28 }
  0xe9   : > { %v376_v32 = vadd.f32 %v375_v29, %v374_v28 }
  0xeb   : > { %381 = vperm.xlu1 %771, %v376_v32  }
 0x166   : > { %v382_v37 = vpop.permute.xlu1 %381 }
 0x167   : > { %v388_v38 = vrot.slane %v382_v37, %v387_v36 }
 0x169   : > { %714 = vmatmul.mubr.msk.f32.vlgmr.msra.gmra.mxu0 %vm389_vm2, %v388_v38 }
 0x229   : > { %v461_v41 = vpop.f32.mrf.mxu0 }
 0x22a   : > { %v462_v42 = vadd.f32 %v461_v41, %v378_v40 }
 0x22b   : > { %v715_v43 = vpop.f32.mrf.mxu0 }
 0x22c   : > { %v465_v44 = vmax.f32 %v462_v42, 0.0 }
 0x22e   : > { %719 = vmatmul.mubr.msk.f32.vlgmr.msra.gmra.mxu1 %vm468_vm4, %v465_v44 }
 0x2ee   : > { %v542_v46 = vpop.f32.mrf.mxu1 }
 0x2ef   : > { %v543_v47 = vadd.f32 %v542_v46, %v467_v45 }
 0x2f0   : > { %v720_v48 = vpop.f32.mrf.mxu1 }
 0x2f1   : > { %v699_v49 = vmul.f32 -1.442695, %v543_v47 }
 0x2f3   : > { %776 = vpow2.f32 %v699_v49 }
 0x300   : > { %v777_v50 = vpop.eup %776 }
 0x301   : > { %v549_v51 = vadd.f32 1.0, %v777_v50 }
 0x303   : > { %778 = vrcp.f32 %v549_v51 }
 0x310   : > { %v779_v53 = vpop.eup %778 }
 0x311   : > { %v555_v54 = vrot.slane %v779_v53, %v554_v52 }
 0x313   : > { %557 = vbcast.lane.b32.xlu1 %v555_v54, 256 }
 0x385   : > { %v558_v55 = vpop.permute.xlu1 %557 }
 0x386   : > { %v559_v56 = vmul.f32 %v558_v55, %v372_v26  ;;  %v573_v57 = vmul.f32 %v558_v55, %v375_v29 }
 0x388   : > { %576 = vperm.xlu1 %771, %v573_v57   ;;  %562 = vperm.xlu0 %772, %v559_v56  }
 0x403   : > { %v577_v62 = vpop.permute.xlu1 %576  ;;  %v563_v63 = vpop.permute.xlu0 %562 }
 0x404   : > { %v570_v0 = vrot.slane %v563_v63, %v569_v61  ;;  %v584_v2 = vrot.slane %v577_v62, %v569_v61 }
 0x406   : > { %v572_v3 = vmul.f32 %v570_v0, %v1036_v1 }
 0x408   : > { %v586_v4 = vadd.f32 %v584_v2, %v572_v3 }
 0x40a   : > { %587 = vst [vmem:[%s336_s22] sm:$0xff] %v586_v4 }
 0x40b   : > { %821 = shalt.err (!%p818_p2)
}
 0x40c   : > { %s822_s17 = scalar_lea.hbm %s601_s26, 128  ;;  %s826_s27 = scalar_lea.hbm %s1114_s8, 256 }
 0x40d   : > { %p823_p4 = scmp.ne.s32.totalorder %s601_s26, %s822_s17  ;;  %p827_p0 = scmp.lt.s32.totalorder %s601_s26, %s1114_s8 }
 0x40e   : > { %p828_p6 = scmp.lt.s32.totalorder %s826_s27, %s822_s17 }
 0x40f   : > { %p824_p9 = pnand %p823_p4, %p1125_p13 }
 0x410   : > { %p829_p11 = por %p828_p6, %p827_p0 }
 0x411   : > { %p825_p7 = pneg %p824_p9 }
 0x413   : > { %p830_p12 = pnand %p829_p11, %p825_p7 }
 0x415   : > { %833 = shalt.err (!%p830_p12)
}
 0x416   : > { %723 = dma.vmem_to_hbm [thread:$0]  (%p1125_p13), %s604_s23, 128, %s601_s26, %s589_s14  }
 0x417 PF: > { %s615_s20 = sand.u32 1, %s860_s29   ;;  %p1126_p1 = scmp.ne.s32.totalorder %s1120_s19, 0 }
 0x418   : > { %p1127_p3 = scmp.ge.s32.totalorder %s872_s10, 2  ;;  %s616_s24 = scalar_lea.sflag [#allocation5], %s615_s20 }
 0x41a   : > { %p730_p5 = pnand %p1127_p3, %p1126_p1 }
 0x41c   : > { %p731_p8 = pneg %p730_p5 }
 0x41e   : > { %855 = dma.done.wait (%p731_p8), %s616_s24, 128  }
 0x41f   : > { %857 = vsyncadd (%p731_p8), %s616_s24, 4294967168  ;;  %p23_p10 = scmp.ge.s32.totalorder %s953_s12, 4   ;;  %s1128_s29 = smov %s864_s30 }
 0x420   : > { %s1129_s30 = smov %s868_s9  ;;  %s1130_s9 = smov %s965_s15 }
 0x421   : > { %s1131_s10 = smov %s953_s12  ;;  %25 = sbr.rel (!%p23_p10) target bundleno = 8 (0x8), region = 100 }
 0x426   :  { %621 = vsyncpa [#allocation4], 1 }
 0x427   :  { %623 = vsyncpa [#allocation4 + $0x1], 1 }
 0x428   :  { %624 = vsyncpa [#allocation5], 1 }
 0x429   :  { %626 = vsyncpa [#allocation5 + $0x1], 1 }

</bundles_post_ra>
